<compile_context>
chip_gen: v7x
topology: tpu7x:2x2x1
jax: 0.10.0
libtpu: 0.0.40
codegen_flags: <defaults>
</compile_context>

<pallas_src>
import jax
import jax.numpy as jnp
from jax.experimental import pallas as pl
from jax.experimental.pallas import tpu as pltpu

_LANES = 1024        # lane width of flattened 2-D layout (multiple of 128)
_BLOCK_ROWS = 512    # rows per block -> 512*1024*4 B = 2 MiB f32 per input block


def _make_bce_kernel(block_rows, total_rows, need_row_mask):
    def kernel(yp_ref, yt_ref, out_ref):
        yp = yp_ref[...].astype(jnp.float32)
        yt = yt_ref[...].astype(jnp.float32)

        if need_row_mask:
            # Last block may overhang the array; replace undefined rows with
            # (yp=1, yt=1), which contributes exactly 0 BCE.
            j = pl.program_id(0)
            row = jax.lax.broadcasted_iota(jnp.int32, yp.shape, 0) + j * block_rows
            valid = row < total_rows
            one = jnp.float32(1.0)
            yp = jnp.where(valid, yp, one)
            yt = jnp.where(valid, yt, one)

        # PyTorch clamps log terms at -100 (handles yp == 0 or yp == 1 safely,
        # clamp happens before the multiply so no inf*0 -> NaN).
        log_p = jnp.maximum(jnp.log(yp), jnp.float32(-100.0))
        log_1mp = jnp.maximum(jnp.log(1.0 - yp), jnp.float32(-100.0))
        # yt*log_p + (1-yt)*log_1mp  ==  log_1mp + yt*(log_p - log_1mp)
        block_sum = jnp.sum(log_1mp + yt * (log_p - log_1mp))

        # Lane-dense per-block partial sum (broadcast scalar; host reads [0,0]).
        out_ref[...] = jnp.broadcast_to(-block_sum, out_ref.shape)

    return kernel


def multiclass_bce(inputs, targets):
    """inputs, targets: [B, C, H, W] probabilities / targets in [0, 1]."""
    B, C, H, W = inputs.shape
    n_per_channel = B * H * W
    total = B * C * H * W

    # Flatten contiguously (free for contiguous NCHW); pad tail with 1.0
    # (zero BCE) only up to a multiple of 8*_LANES so the 2-D reshape is
    # (8,128)-tileable.  Padding is skipped entirely when already aligned.
    yp = inputs.reshape(-1)
    yt = targets.reshape(-1)
    chunk = 8 * _LANES
    total_pad = ((total + chunk - 1) // chunk) * chunk
    if total_pad != total:
        pad = total_pad - total
        yp = jnp.pad(yp, (0, pad), constant_values=1.0)
        yt = jnp.pad(yt, (0, pad), constant_values=1.0)

    rows = total_pad // _LANES                   # multiple of 8
    yp2 = yp.reshape(rows, _LANES)
    yt2 = yt.reshape(rows, _LANES)

    block_rows = min(_BLOCK_ROWS, rows)
    n_blocks = (rows + block_rows - 1) // block_rows
    need_row_mask = (rows % block_rows) != 0

    kernel = _make_bce_kernel(block_rows, rows, need_row_mask)

    partials = pl.pallas_call(
        kernel,
        out_shape=jax.ShapeDtypeStruct((n_blocks, 8, 128), jnp.float32),
        grid_spec=pltpu.PrefetchScalarGridSpec(
            num_scalar_prefetch=0,
            grid=(n_blocks,),
            in_specs=[
                pl.BlockSpec((block_rows, _LANES), lambda j: (j, 0)),
                pl.BlockSpec((block_rows, _LANES), lambda j: (j, 0)),
            ],
            out_specs=pl.BlockSpec((1, 8, 128), lambda j: (j, 0, 0)),
        ),
        compiler_params=pltpu.CompilerParams(
            dimension_semantics=("parallel",)),
    )(yp2, yt2)

    # Tiny final reduction of per-block partials; per-channel mean summed over
    # channels == global BCE sum / (B*H*W).
    total_bce = jnp.sum(partials[:, 0, 0])
    return total_bce / jnp.float32(n_per_channel)


def _reference(inputs, targets):
    loss = jnp.float32(0.0)
    for i in range(inputs.shape[1]):
        yp = inputs[:, i].astype(jnp.float32)
        yt = targets[:, i].astype(jnp.float32)
        log_p = jnp.maximum(jnp.log(yp), -100.0)
        log_1mp = jnp.maximum(jnp.log(1.0 - yp), -100.0)
        loss = loss + jnp.mean(-(yt * log_p + (1.0 - yt) * log_1mp))
    return loss


if __name__ == "__main__":
    key = jax.random.PRNGKey(0)
    k1, k2 = jax.random.split(key)
    B, C, H, W = 2, 4, 16, 16
    inputs = jax.random.uniform(k1, (B, C, H, W), dtype=jnp.float32,
                                minval=1e-4, maxval=1.0 - 1e-4)
    targets = (jax.random.uniform(k2, (B, C, H, W)) > 0.5).astype(jnp.float32)

    loss = multiclass_bce(inputs, targets)
    jax.block_until_ready(loss)

    ref = _reference(inputs, targets)
    assert jnp.allclose(loss, ref, rtol=1e-5, atol=1e-5), (loss, ref)
    print("KERNEL_OK")
</pallas_src>

<mosaic_0001>
module attributes {stable_mosaic.version = 11 : i64} {
  func.func @kernel(%arg0: i32, %arg1: memref<8x1024xf32, #tpu.memory_space<vmem>>, %arg2: memref<8x1024xf32, #tpu.memory_space<vmem>>, %arg3: memref<1x8x128xf32, #tpu.memory_space<vmem>>) attributes {dimension_semantics = [#tpu.dimension_semantics<parallel>], iteration_bounds = array<i64: 1>, scalar_prefetch = 0 : i64, scratch_operands = 0 : i64, tpu.core_type = #tpu.core_type<tc>, window_params = [{transform_indices = @transform_0, window_bounds = array<i64: 8, 1024>}, {transform_indices = @transform_1, window_bounds = array<i64: 8, 1024>}, {transform_indices = @transform_2, window_bounds = array<i64: 1, 8, 128>}]} {
    %c0 = arith.constant 0 : index
    %c0_0 = arith.constant 0 : index
    %0 = vector.load %arg1[%c0, %c0_0] : memref<8x1024xf32, #tpu.memory_space<vmem>>, vector<8x1024xf32>
    %c0_1 = arith.constant 0 : index
    %c0_2 = arith.constant 0 : index
    %1 = vector.load %arg2[%c0_1, %c0_2] : memref<8x1024xf32, #tpu.memory_space<vmem>>, vector<8x1024xf32>
    %2 = math.log %0 : vector<8x1024xf32>
    %cst = arith.constant -1.000000e+02 : f32
    %3 = vector.broadcast %cst : f32 to vector<8x1024xf32>
    %4 = arith.maximumf %2, %3 : vector<8x1024xf32>
    %cst_3 = arith.constant 1.000000e+00 : f32
    %5 = vector.broadcast %cst_3 : f32 to vector<8x1024xf32>
    %6 = arith.subf %5, %0 : vector<8x1024xf32>
    %7 = math.log %6 : vector<8x1024xf32>
    %cst_4 = arith.constant -1.000000e+02 : f32
    %8 = vector.broadcast %cst_4 : f32 to vector<8x1024xf32>
    %9 = arith.maximumf %7, %8 : vector<8x1024xf32>
    %10 = arith.subf %4, %9 : vector<8x1024xf32>
    %11 = arith.mulf %1, %10 : vector<8x1024xf32>
    %12 = arith.addf %9, %11 : vector<8x1024xf32>
    %13 = vector.shape_cast %12 : vector<8x1024xf32> to vector<1x8x1024xf32>
    %cst_5 = arith.constant dense<0.000000e+00> : vector<1xf32>
    %14 = vector.multi_reduction <add>, %13, %cst_5 [1, 2] : vector<1x8x1024xf32> to vector<1xf32>
    %15 = vector.shape_cast %14 : vector<1xf32> to vector<1x1x1xf32>
    %16 = vector.extract %15[0, 0, 0] : f32 from vector<1x1x1xf32>
    %cst_6 = arith.constant 0.000000e+00 : f32
    %17 = arith.subf %cst_6, %16 : f32
    %18 = vector.broadcast %17 : f32 to vector<1x8x128xf32>
    %c0_7 = arith.constant 0 : index
    %c0_8 = arith.constant 0 : index
    %c0_9 = arith.constant 0 : index
    %19 = vector.load %arg3[%c0_7, %c0_8, %c0_9] : memref<1x8x128xf32, #tpu.memory_space<vmem>>, vector<1x8x128xf32>
    tpu.vector_store %arg3[%c0_7, %c0_8, %c0_9], %18 {strides = array<i32>} : memref<1x8x128xf32, #tpu.memory_space<vmem>>, vector<1x8x128xf32>,
    return
  }
  func.func @transform_0(%arg0: i32) -> (i32, i32) {
    %c0_i32 = arith.constant 0 : i32
    %c0_i32_0 = arith.constant 0 : i32
    return %arg0, %c0_i32 : i32, i32
  }
  func.func @transform_1(%arg0: i32) -> (i32, i32) {
    %c0_i32 = arith.constant 0 : i32
    %c0_i32_0 = arith.constant 0 : i32
    return %arg0, %c0_i32 : i32, i32
  }
  func.func @transform_2(%arg0: i32) -> (i32, i32, i32) {
    %c0_i32 = arith.constant 0 : i32
    %c0_i32_0 = arith.constant 0 : i32
    %c0_i32_1 = arith.constant 0 : i32
    return %arg0, %c0_i32, %c0_i32_0 : i32, i32, i32
  }
}

</mosaic_0001>

<bundles_post_ra>
// kernel: tpu_custom_call.1
= control target key start
LH: loop header
LB: loop body
LE: loop exit
PB: predicated region body
PF: predicated region fallthrough
CT: control target
= control target key end

     0   :  { %7 = vsyncpa [#allocation3], 0  ;;  %s330_s0 = inlined_call_operand.hbm [shape: f32[8,1024], index: 0, kind: input, shape index: {}]   ;;  %s331_s1 = inlined_call_operand.hbm [shape: f32[8,1024], index: 1, kind: input, shape index: {}]   ;;  %s332_s2 = inlined_call_operand.hbm [shape: f32[1,8,128], index: 2, kind: output, shape index: {}]  }
   0x1   :  { %8 = vsyncpa [#allocation6], 0 }
   0x2   :  { %9 = vsyncpa [#allocation4], 0  ;;  %s276_s9 = smov [#allocation2]   ;;  %s277_s11 = smov [#allocation5]  }
   0x3   :  { %s16_s10 = sshll.u32 %s276_s9, 4  ;;  %s26_s12 = sshll.u32 %s277_s11, 4  ;;  %s17_s10 = int_to_ptr.vmem [resolvable:$true] %s16_s10  ;;  %s27_s12 = int_to_ptr.vmem [resolvable:$true] %s26_s12 }
   0x4   :  { %s204_s15 = scalar_lea.hbm %s330_s0, 1024 }
   0x5   :  { %p205_p0 = scmp.ne.s32.totalorder %s330_s0, %s204_s15  ;;  %p208_p1 = scmp.lt.u32.totalorder %s204_s15, %s330_s0 }
   0x7   :  { %p210_p2 = pnand %p208_p1, %p205_p0 }
   0x9   :  { %213 = shalt.err (!%p210_p2)
}
   0xa   :  { %s214_s20 = scalar_lea.vmem %s17_s10, 1024  ;;  %p219_p4 = scmp.lt.s32.totalorder %s17_s10, %s17_s10 }
   0xb   :  { %p215_p3 = scmp.ne.s32.totalorder %s17_s10, %s214_s20  ;;  %p220_p5 = scmp.lt.s32.totalorder %s214_s20, %s214_s20 }
   0xd   :  { %p221_p6 = por %p220_p5, %p219_p4 }
   0xf   :  { %p222_p7 = pnand %p221_p6, %p215_p3 }
  0x11   :  { %225 = shalt.err (!%p222_p7)
}
  0x12   :  { %19 = dma.hbm_to_vmem [thread:$0]  %s330_s0, 1024, %s17_s10, [#allocation3]  }
  0x13   :  { %s226_s25 = scalar_lea.hbm %s331_s1, 1024 }
  0x14   :  { %p227_p8 = scmp.ne.s32.totalorder %s331_s1, %s226_s25  ;;  %p230_p9 = scmp.lt.u32.totalorder %s226_s25, %s331_s1 }
  0x16   :  { %p232_p10 = pnand %p230_p9, %p227_p8 }
  0x18   :  { %235 = shalt.err (!%p232_p10)
}
  0x19   :  { %s236_s30 = scalar_lea.vmem %s27_s12, 1024  ;;  %p241_p12 = scmp.lt.s32.totalorder %s27_s12, %s27_s12 }
  0x1a   :  { %p237_p11 = scmp.ne.s32.totalorder %s27_s12, %s236_s30  ;;  %p242_p13 = scmp.lt.s32.totalorder %s236_s30, %s236_s30 }
  0x1c   :  { %p243_p0 = por %p242_p13, %p241_p12 }
  0x1e   :  { %p244_p1 = pnand %p243_p0, %p237_p11 }
  0x20   :  { %247 = shalt.err (!%p244_p1)
}
  0x21   :  { %29 = dma.hbm_to_vmem [thread:$0]  %s331_s1, 1024, %s27_s12, [#allocation6]  }
  0x22   :  { %270 = dma.done.wait [#allocation3], 1024  }
  0x23   :  { %271 = vsyncadd [#allocation3], 4294966272 }
  0x24   :  { %272 = dma.done.wait [#allocation6], 1024  }
  0x25   :  { %273 = vsyncadd [#allocation6], 4294966272  ;;  %v36_v0 = vld [vmem:[#allocation2] sm:$0xff]  ;;  %v37_v1 = vld [vmem:[#allocation2 + $0x8] sm:$0xff]  ;;  %s278_s1 = smov [#allocation7]  }
  0x26   :  { %172 = vlog2.f32 %v36_v0  ;;  %v38_v2 = vld [vmem:[#allocation2 + $0x10] sm:$0xff]  ;;  %v39_v3 = vld [vmem:[#allocation2 + $0x18] sm:$0xff]  ;;  %v40_v4 = vld [vmem:[#allocation2 + $0x20] sm:$0xff]  ;;  %v76_v6 = vsub.f32 1.0, %v36_v0  ;;  %v77_v8 = vsub.f32 1.0, %v37_v1  ;;  %s157_s4 = sshll.u32 %s278_s1, 4  ;;  %s158_s4 = int_to_ptr.vmem [resolvable:$true] %s157_s4 }
  0x27   :  { %174 = vlog2.f32 %v37_v1  ;;  %v41_v5 = vld [vmem:[#allocation2 + $0x28] sm:$0xff]  ;;  %v42_v7 = vld [vmem:[#allocation2 + $0x30] sm:$0xff]  ;;  %v43_v9 = vld [vmem:[#allocation2 + $0x38] sm:$0xff]  ;;  %v78_v10 = vsub.f32 1.0, %v38_v2  ;;  %v79_v11 = vsub.f32 1.0, %v39_v3  ;;  %v80_v12 = vsub.f32 1.0, %v40_v4  ;;  %p253_p3 = scmp.lt.s32.totalorder %s158_s4, %s158_s4 }
  0x28   :  { %176 = vlog2.f32 %v38_v2  ;;  %v81_v13 = vsub.f32 1.0, %v41_v5  ;;  %v82_v15 = vsub.f32 1.0, %v42_v7  ;;  %v83_v17 = vsub.f32 1.0, %v43_v9  ;;  %v44_v45 = vld [vmem:[#allocation5] sm:$0xff]  ;;  %v45_v51 = vld [vmem:[#allocation5 + $0x8] sm:$0xff]  ;;  %v46_v57 = vld [vmem:[#allocation5 + $0x10] sm:$0xff] }
  0x29   :  { %178 = vlog2.f32 %v39_v3  ;;  %v47_v63 = vld [vmem:[#allocation5 + $0x18] sm:$0xff]  ;;  %s248_s7 = scalar_lea.vmem %s158_s4, 128 }
  0x2a   :  { %180 = vlog2.f32 %v40_v4  ;;  %v48_v4 = vld [vmem:[#allocation5 + $0x20] sm:$0xff]  ;;  %p249_p2 = scmp.ne.s32.totalorder %s158_s4, %s248_s7  ;;  %p254_p4 = scmp.lt.s32.totalorder %s248_s7, %s248_s7 }
  0x2b   :  { %182 = vlog2.f32 %v41_v5 }
  0x2c   :  { %184 = vlog2.f32 %v42_v7  ;;  %p255_p5 = por %p254_p4, %p253_p3 }
  0x2d   :  { %186 = vlog2.f32 %v43_v9  ;;  %v49_v9 = vld [vmem:[#allocation5 + $0x28] sm:$0xff] }
  0x2e   :  { %188 = vlog2.f32 %v76_v6  ;;  %p256_p6 = pnand %p255_p5, %p249_p2 }
  0x2f   :  { %190 = vlog2.f32 %v77_v8 }
  0x30   :  { %v173_v14 = vpop.eup %172  ;;  %192 = vlog2.f32 %v78_v10 }
  0x31   :  { %v175_v16 = vpop.eup %174  ;;  %194 = vlog2.f32 %v79_v11  ;;  %v53_v22 = vmul.f32 0.6931472, %v173_v14 }
  0x32   :  { %v177_v18 = vpop.eup %176  ;;  %196 = vlog2.f32 %v80_v12  ;;  %v55_v24 = vmul.f32 0.6931472, %v175_v16 }
  0x33   :  { %v179_v19 = vpop.eup %178  ;;  %198 = vlog2.f32 %v81_v13  ;;  %v57_v26 = vmul.f32 0.6931472, %v177_v18  ;;  %v68_v33 = vmax.f32 %v53_v22, -100.0  ;;  %v50_v18 = vld [vmem:[#allocation5 + $0x30] sm:$0xff] }
  0x34   :  { %v181_v20 = vpop.eup %180  ;;  %200 = vlog2.f32 %v82_v15  ;;  %v59_v27 = vmul.f32 0.6931472, %v179_v19  ;;  %v69_v37 = vmax.f32 %v55_v24, -100.0 }
  0x35   :  { %v183_v21 = vpop.eup %182  ;;  %202 = vlog2.f32 %v83_v17  ;;  %v61_v29 = vmul.f32 0.6931472, %v181_v20  ;;  %v70_v40 = vmax.f32 %v57_v26, -100.0  ;;  %v51_v26 = vld [vmem:[#allocation5 + $0x38] sm:$0xff] }
  0x36   :  { %v185_v23 = vpop.eup %184  ;;  %v63_v30 = vmul.f32 0.6931472, %v183_v21  ;;  %v71_v41 = vmax.f32 %v59_v27, -100.0 }
  0x37   :  { %v187_v25 = vpop.eup %186  ;;  %v65_v32 = vmul.f32 0.6931472, %v185_v23  ;;  %v72_v46 = vmax.f32 %v61_v29, -100.0 }
  0x38   :  { %v189_v28 = vpop.eup %188  ;;  %v67_v36 = vmul.f32 0.6931472, %v187_v25  ;;  %v73_v47 = vmax.f32 %v63_v30, -100.0 }
  0x39   :  { %v191_v31 = vpop.eup %190  ;;  %v85_v34 = vmul.f32 0.6931472, %v189_v28  ;;  %v74_v52 = vmax.f32 %v65_v32, -100.0 }
  0x3a   :  { %v193_v35 = vpop.eup %192  ;;  %v87_v38 = vmul.f32 0.6931472, %v191_v31  ;;  %v75_v58 = vmax.f32 %v67_v36, -100.0 }
  0x3b   :  { %v195_v39 = vpop.eup %194  ;;  %v89_v42 = vmul.f32 0.6931472, %v193_v35  ;;  %v100_v43 = vmax.f32 %v85_v34, -100.0 }
  0x3c   :  { %v197_v44 = vpop.eup %196  ;;  %v91_v48 = vmul.f32 0.6931472, %v195_v39  ;;  %v101_v49 = vmax.f32 %v87_v38, -100.0 }
  0x3d   :  { %v199_v50 = vpop.eup %198  ;;  %v93_v53 = vmul.f32 0.6931472, %v197_v44  ;;  %v102_v54 = vmax.f32 %v89_v42, -100.0  ;;  %v108_v55 = vsub.f32 %v68_v33, %v100_v43 }
  0x3e   :  { %v201_v56 = vpop.eup %200  ;;  %v95_v59 = vmul.f32 0.6931472, %v199_v50  ;;  %v103_v60 = vmax.f32 %v91_v48, -100.0  ;;  %v109_v61 = vsub.f32 %v69_v37, %v101_v49 }
  0x3f   :  { %v203_v62 = vpop.eup %202  ;;  %v97_v0 = vmul.f32 0.6931472, %v201_v56  ;;  %v104_v1 = vmax.f32 %v93_v53, -100.0  ;;  %v110_v2 = vsub.f32 %v70_v40, %v102_v54  ;;  %v116_v3 = vmul.f32 %v108_v55, %v44_v45 }
  0x40   :  { %v99_v5 = vmul.f32 0.6931472, %v203_v62  ;;  %v105_v6 = vmax.f32 %v95_v59, -100.0  ;;  %v111_v7 = vsub.f32 %v71_v41, %v103_v60  ;;  %v117_v8 = vmul.f32 %v109_v61, %v45_v51 }
  0x41   :  { %v106_v10 = vmax.f32 %v97_v0, -100.0  ;;  %v112_v11 = vsub.f32 %v72_v46, %v104_v1  ;;  %v118_v12 = vmul.f32 %v110_v2, %v46_v57  ;;  %v124_v13 = vadd.f32 %v116_v3, %v100_v43 }
  0x42   :  { %v107_v14 = vmax.f32 %v99_v5, -100.0  ;;  %v113_v15 = vsub.f32 %v73_v47, %v105_v6  ;;  %v119_v16 = vmul.f32 %v111_v7, %v47_v63  ;;  %v125_v17 = vadd.f32 %v117_v8, %v101_v49 }
  0x43   :  { %v114_v19 = vsub.f32 %v74_v52, %v106_v10  ;;  %v120_v20 = vmul.f32 %v112_v11, %v48_v4  ;;  %v126_v21 = vadd.f32 %v118_v12, %v102_v54 }
  0x44   :  { %v115_v22 = vsub.f32 %v75_v58, %v107_v14  ;;  %v121_v23 = vmul.f32 %v113_v15, %v49_v9  ;;  %v127_v24 = vadd.f32 %v119_v16, %v103_v60  ;;  %v132_v25 = vadd.f32 %v125_v17, %v124_v13 }
  0x45   :  { %v122_v27 = vmul.f32 %v114_v19, %v50_v18  ;;  %v128_v28 = vadd.f32 %v120_v20, %v104_v1 }
  0x46   :  { %v133_v29 = vadd.f32 %v132_v25, %v126_v21  ;;  %v123_v30 = vmul.f32 %v115_v22, %v51_v26  ;;  %v129_v31 = vadd.f32 %v121_v23, %v105_v6 }
  0x47   :  { %v130_v33 = vadd.f32 %v122_v27, %v106_v10 }
  0x48   :  { %v134_v32 = vadd.f32 %v133_v29, %v127_v24  ;;  %v131_v35 = vadd.f32 %v123_v30, %v107_v14 }
  0x4a   :  { %v135_v34 = vadd.f32 %v134_v32, %v128_v28 }
  0x4c   :  { %v136_v36 = vadd.f32 %v135_v34, %v129_v31 }
  0x4e   :  { %v137_v37 = vadd.f32 %v136_v36, %v130_v33 }
  0x50   :  { %v138_v38 = vadd.f32 %v137_v37, %v131_v35 }
  0x52   :  { %139 = vadd.xlane.f32.xlu0 %v138_v38 }
  0xdf   :  { %v140_v39 = vpop.xlane.xlu0 %139 }
  0xe0   :  { %v141_v40 = vrot.slane %v140_v39, 4 }
  0xe2   :  { %v142_v41 = vadd.f32 %v141_v40, %v140_v39 }
  0xe4   :  { %v143_v42 = vrot.slane %v142_v41, 2 }
  0xe6   :  { %v144_v43 = vadd.f32 %v143_v42, %v142_v41 }
  0xe8   :  { %v145_v44 = vrot.slane %v144_v43, 1 }
  0xea   :  { %v146_v45 = vadd.f32 %v145_v44, %v144_v43 }
  0xec   :  { %167 = vpush %v146_v45 }
 0x11d   :  { %s168_s5 = spop %167 }
 0x11e   :  { %s148_s6 = ssub.f32 0.0, %s168_s5 }
 0x120   :  { %v149_v46 = vstv %s148_s6 }
 0x121   :  { %150 = vst [vmem:[#allocation7] sm:$0xff] %v149_v46 }
 0x122   :  { %259 = shalt.err (!%p256_p6)
}
 0x123   :  { %s260_s10 = scalar_lea.hbm %s332_s2, 128 }
 0x124   :  { %p261_p7 = scmp.ne.s32.totalorder %s332_s2, %s260_s10  ;;  %p264_p8 = scmp.lt.u32.totalorder %s260_s10, %s332_s2 }
 0x126   :  { %p266_p9 = pnand %p264_p8, %p261_p7 }
 0x128   :  { %269 = shalt.err (!%p266_p9)
}
 0x129   :  { %160 = dma.vmem_to_hbm [thread:$0]  %s158_s4, 128, %s332_s2, [#allocation4]  }
 0x12a   :  { %274 = dma.done.wait [#allocation4], 128  }
 0x12b   :  { %275 = vsyncadd [#allocation4], 4294967168 }
 0x12c   :  { %164 = vsyncpa [#allocation3], 1 }
 0x12d   :  { %165 = vsyncpa [#allocation6], 1 }
 0x12e   :  { %166 = vsyncpa [#allocation4], 1 }

</bundles_post_ra>
